<compile_context>
chip_gen: v7x
topology: tpu7x:2x2x1
jax: 0.10.0
libtpu: 0.0.40
codegen_flags: <defaults>
</compile_context>

<pallas_src>
import functools

import jax
import jax.numpy as jnp
from jax.experimental import pallas as pl
from jax.experimental.pallas import tpu as pltpu


def _round_up(v, m):
    return ((v + m - 1) // m) * m


def _cdiv(a, b):
    return -(-a // b)


def _sublane_multiple(dtype):
    # f32 -> 8, bf16/f16 -> 16, int8/fp8 -> 32 (sub-32-bit packs along sublanes)
    return {4: 8, 2: 16, 1: 32}.get(jnp.dtype(dtype).itemsize, 8)


def _mdn_fused_kernel(exp_start, compute_dtype, x_ref, w_ref, b_ref, out_ref):
    """One batch tile: fused [pi | mu | sigma] linear; exp on sigma columns.

    exp_start is a static column offset (= G + G*O): columns >= exp_start are
    the sigma section (exp applied), everything below is the plain linear
    (pi + mu) section.  One full-tile, lane-dense store.
    """
    x = x_ref[...]
    if x.dtype != compute_dtype:
        x = x.astype(compute_dtype)          # in-vreg cast: no extra HBM traffic
    y = jnp.dot(x, w_ref[...], preferred_element_type=jnp.float32) + b_ref[...]
    col = jax.lax.broadcasted_iota(jnp.int32, y.shape, dimension=1)
    # exp rides the EUP slot (slack); select on VPU; single unmasked store.
    out_ref[...] = jnp.where(col >= exp_start, jnp.exp(y), y)


def prepare_params(params, *, weight_dtype=jnp.float32):
    """One-time packing of the three heads into a fused lane-dense weight/bias.

    Column layout: [0,G) pi | [G,G+GO) mu | [G+GO,G+2GO) sigma | zero pad.
    Call ONCE outside the per-step forward (or cache the result) so the
    concat / pad / cast does not cost a weight-sized HBM round trip per call.
    On v6e/v7x pass weight_dtype=jnp.bfloat16 to halve the resident weight
    VMEM footprint and the one-time weight HBM read (accumulation stays f32).
    """
    G = params["w_pi"].shape[1]
    GO = params["w_sigma"].shape[1]
    n_real = G + 2 * GO
    n_pad = _round_up(n_real, 128)

    w = jnp.concatenate(
        [params["w_pi"], params["w_mu"], params["w_sigma"]], axis=1)
    w = jnp.pad(w, ((0, 0), (0, n_pad - n_real))).astype(weight_dtype)

    b = jnp.concatenate(
        [params["b_pi"], params["b_mu"], params["b_sigma"]], axis=1)
    b = jnp.pad(b, ((0, 0), (0, n_pad - n_real))).astype(jnp.float32)
    return w, b


def mdn_forward(x, w_fused, b_fused, *, num_gaussians, out_features, block_b=512):
    """Pallas-backed MDN forward.

    x:        (B, D) float32
    w_fused:  (D, n_pad) fused weight from prepare_params (f32 or bf16)
    b_fused:  (1, n_pad) fused bias (f32)
    returns (pi (B,G), sigma (B,G,O), mu (B,G,O))
    """
    B, D = x.shape
    G, O = num_gaussians, out_features
    GO = G * O
    n_pad = w_fused.shape[1]
    assert w_fused.shape[0] == D and n_pad >= G + 2 * GO
    compute_dtype = w_fused.dtype

    # ---- batch tiling ------------------------------------------------------
    # Sublane-align for the widest constraint (native x dtype / MXU feed dtype)
    # and ensure >= 2 grid steps when the batch allows, so on v7x the
    # "parallel" batch axis actually shards across both TensorCores.
    sub = max(_sublane_multiple(x.dtype), _sublane_multiple(compute_dtype))
    bp0 = _round_up(B, sub)
    n_steps = max(1, _cdiv(bp0, block_b))
    if n_steps == 1 and bp0 >= 2 * sub:
        n_steps = 2
    tb = _round_up(_cdiv(bp0, n_steps), sub)
    bp = tb * n_steps
    x_p = jnp.pad(x, ((0, bp - B), (0, 0))) if bp != B else x

    w_itemsize = jnp.dtype(compute_dtype).itemsize
    x_itemsize = jnp.dtype(x.dtype).itemsize

    # ---- VMEM budget: 1x weight + 1x bias + 2x x-tile + 2x out-tile ---------
    vmem_need = (D * n_pad * w_itemsize + n_pad * 4
                 + 2 * tb * D * x_itemsize + 2 * tb * n_pad * 4)
    vmem_limit = min(64 << 20, max(32 << 20, int(vmem_need * 1.25) + (2 << 20)))

    cost = pl.CostEstimate(
        flops=2 * bp * D * n_pad,
        transcendentals=bp * n_pad,
        bytes_accessed=(bp * D * x_itemsize        # x (streamed)
                        + D * n_pad * w_itemsize   # fused weight (read once)
                        + n_pad * 4                # fused bias
                        + bp * n_pad * 4),         # fused output
    )

    kernel = functools.partial(_mdn_fused_kernel, G + GO, compute_dtype)

    out = pl.pallas_call(
        kernel,
        out_shape=jax.ShapeDtypeStruct((bp, n_pad), jnp.float32),
        grid_spec=pltpu.PrefetchScalarGridSpec(
            num_scalar_prefetch=0,
            grid=(bp // tb,),
            in_specs=[
                # x: streamed per batch tile (default double-buffered pipeline)
                pl.BlockSpec((tb, D), lambda i: (i, 0)),
                # fused weight / bias: grid-invariant -> fetch once, single buffer
                pl.BlockSpec((D, n_pad), lambda i: (0, 0),
                             pipeline_mode=pl.Buffered(1)),
                pl.BlockSpec((1, n_pad), lambda i: (0, 0),
                             pipeline_mode=pl.Buffered(1)),
            ],
            out_specs=pl.BlockSpec((tb, n_pad), lambda i: (i, 0)),
        ),
        compiler_params=pltpu.CompilerParams(
            dimension_semantics=("parallel",),      # shard batch across TCs (v7x)
            vmem_limit_bytes=vmem_limit,
        ),
        cost_estimate=cost,
    )(x_p, w_fused, b_fused)

    # TODO(synk): if the consumer can read the packed (B, n_pad) slab
    # [pi | mu | sigma] directly, skip these slices/reshapes (each post-kernel
    # slice is an extra HBM pass over the output).
    pi = out[:B, :G]
    mu = out[:B, G:G + GO].reshape(B, G, O)
    sigma = out[:B, G + GO:G + 2 * GO].reshape(B, G, O)
    return pi, sigma, mu


def init_params(key, in_features, out_features, num_gaussians):
    """Deterministic synthetic init (PyTorch Linear-style uniform bounds)."""
    D, O, G = in_features, out_features, num_gaussians
    k = 1.0 / jnp.sqrt(jnp.float32(D))
    keys = jax.random.split(key, 6)
    uni = lambda kk, shape: jax.random.uniform(
        kk, shape, dtype=jnp.float32, minval=-k, maxval=k)
    return {
        "w_pi": uni(keys[0], (D, G)),
        "b_pi": uni(keys[1], (1, G)),
        "w_sigma": uni(keys[2], (D, G * O)),
        "b_sigma": uni(keys[3], (1, G * O)),
        "w_mu": uni(keys[4], (D, G * O)),
        "b_mu": uni(keys[5], (1, G * O)),
    }


if __name__ == "__main__":
    # Small shapes consistent with the module: B x D input.
    B, D, O, G = 8, 32, 4, 8

    key = jax.random.PRNGKey(0)
    k_x, k_p = jax.random.split(key)
    x = jax.random.normal(k_x, (B, D), dtype=jnp.float32)
    params = init_params(k_p, D, O, G)

    # One-time weight packing (hoisted out of the per-call forward).
    w_fused, b_fused = prepare_params(params, weight_dtype=jnp.float32)

    fwd = jax.jit(functools.partial(mdn_forward, num_gaussians=G, out_features=O))
    pi, sigma, mu = fwd(x, w_fused, b_fused)
    jax.block_until_ready((pi, sigma, mu))

    # Reference check in plain JAX (same math as the PyTorch forward).
    pi_ref = x @ params["w_pi"] + params["b_pi"]
    sigma_ref = jnp.exp(x @ params["w_sigma"] + params["b_sigma"]).reshape(B, G, O)
    mu_ref = (x @ params["w_mu"] + params["b_mu"]).reshape(B, G, O)

    assert pi.shape == (B, G) and sigma.shape == (B, G, O) and mu.shape == (B, G, O)
    assert jnp.allclose(pi, pi_ref, atol=1e-5, rtol=1e-5)
    assert jnp.allclose(sigma, sigma_ref, atol=1e-5, rtol=1e-5)
    assert jnp.allclose(mu, mu_ref, atol=1e-5, rtol=1e-5)

    print("KERNEL_OK")
</pallas_src>

<mosaic_0001>
module attributes {stable_mosaic.version = 11 : i64} {
  func.func @_mdn_fused_kernel(%arg0: i32, %arg1: memref<8x32xf32, #tpu.memory_space<vmem>>, %arg2: memref<32x128xf32, #tpu.memory_space<vmem>>, %arg3: memref<1x128xf32, #tpu.memory_space<vmem>>, %arg4: memref<8x128xf32, #tpu.memory_space<vmem>>) attributes {dimension_semantics = [#tpu.dimension_semantics<parallel>], iteration_bounds = array<i64: 1>, scalar_prefetch = 0 : i64, scratch_operands = 0 : i64, tpu.core_type = #tpu.core_type<tc>, window_params = [{transform_indices = @transform_0, window_bounds = array<i64: 8, 32>}, {pipeline_mode = #tpu.pipeline_mode<synchronous>, transform_indices = @transform_1, window_bounds = array<i64: 32, 128>}, {pipeline_mode = #tpu.pipeline_mode<synchronous>, transform_indices = @transform_2, window_bounds = array<i64: 1, 128>}, {transform_indices = @transform_3, window_bounds = array<i64: 8, 128>}]} {
    %c0 = arith.constant 0 : index
    %c0_0 = arith.constant 0 : index
    %0 = vector.load %arg1[%c0, %c0_0] : memref<8x32xf32, #tpu.memory_space<vmem>>, vector<8x32xf32>
    %c0_1 = arith.constant 0 : index
    %c0_2 = arith.constant 0 : index
    %1 = vector.load %arg2[%c0_1, %c0_2] : memref<32x128xf32, #tpu.memory_space<vmem>>, vector<32x128xf32>
    %cst = arith.constant dense<0.000000e+00> : vector<8x128xf32>
    %2 = tpu.matmul %0, %1, %cst {dimension_numbers = #tpu.dot_dimension_numbers<[1], [0], [0], [1], [0, 0, 1, 1], [], []>} : vector<8x32xf32>, vector<32x128xf32>, vector<8x128xf32> -> vector<8x128xf32>
    %c0_3 = arith.constant 0 : index
    %c0_4 = arith.constant 0 : index
    %3 = vector.load %arg3[%c0_3, %c0_4] : memref<1x128xf32, #tpu.memory_space<vmem>>, vector<1x128xf32>
    %4 = vector.broadcast %3 : vector<1x128xf32> to vector<8x128xf32>
    %5 = arith.addf %2, %4 : vector<8x128xf32>
    %6 = tpu.iota {dimensions = array<i32: 1>} : vector<8x128xi32>
    %c40_i32 = arith.constant 40 : i32
    %7 = vector.broadcast %c40_i32 : i32 to vector<8x128xi32>
    %8 = arith.cmpi sge, %6, %7 : vector<8x128xi32>
    %9 = math.exp %5 : vector<8x128xf32>
    %10 = arith.select %8, %9, %5 : vector<8x128xi1>, vector<8x128xf32>
    %c0_5 = arith.constant 0 : index
    %c0_6 = arith.constant 0 : index
    %11 = vector.load %arg4[%c0_5, %c0_6] : memref<8x128xf32, #tpu.memory_space<vmem>>, vector<8x128xf32>
    tpu.vector_store %arg4[%c0_5, %c0_6], %10 {strides = array<i32>} : memref<8x128xf32, #tpu.memory_space<vmem>>, vector<8x128xf32>,
    return
  }
  func.func @transform_0(%arg0: i32) -> (i32, i32) {
    %c0_i32 = arith.constant 0 : i32
    %c0_i32_0 = arith.constant 0 : i32
    return %arg0, %c0_i32 : i32, i32
  }
  func.func @transform_1(%arg0: i32) -> (i32, i32) {
    %c0_i32 = arith.constant 0 : i32
    %c0_i32_0 = arith.constant 0 : i32
    %c0_i32_1 = arith.constant 0 : i32
    return %c0_i32, %c0_i32_0 : i32, i32
  }
  func.func @transform_2(%arg0: i32) -> (i32, i32) {
    %c0_i32 = arith.constant 0 : i32
    %c0_i32_0 = arith.constant 0 : i32
    %c0_i32_1 = arith.constant 0 : i32
    return %c0_i32, %c0_i32_0 : i32, i32
  }
  func.func @transform_3(%arg0: i32) -> (i32, i32) {
    %c0_i32 = arith.constant 0 : i32
    %c0_i32_0 = arith.constant 0 : i32
    return %arg0, %c0_i32 : i32, i32
  }
}

</mosaic_0001>

<bundles_post_ra>
// kernel: mdn_forward.1
= control target key start
LH: loop header
LB: loop body
LE: loop exit
PB: predicated region body
PF: predicated region fallthrough
CT: control target
= control target key end

     0   :  { %8 = vsyncpa [#allocation3], 0  ;;  %s284_s0 = inlined_call_operand.hbm [shape: f32[8,32], index: 0, kind: input, shape index: {}]   ;;  %s285_s1 = inlined_call_operand.hbm [shape: f32[32,128], index: 1, kind: input, shape index: {}]   ;;  %s286_s2 = inlined_call_operand.vmem [shape: f32[1,128], index: 2, kind: input, shape index: {}]   ;;  %s287_s3 = inlined_call_operand.vmem [shape: f32[8,128], index: 3, kind: output, shape index: {}]  }
   0x1   :  { %9 = vsyncpa [#allocation5], 0  ;;  %s220_s12 = smov [#allocation2]   ;;  %s221_s14 = smov [#allocation4]  }
   0x2   :  { %s16_s13 = sshll.u32 %s220_s12, 4  ;;  %s25_s15 = sshll.u32 %s221_s14, 4  ;;  %s17_s13 = int_to_ptr.vmem [resolvable:$true] %s16_s13  ;;  %s247_s15 = int_to_ptr.vmem [resolvable:$true] %s25_s15 }
   0x3   :  { %s172_s18 = scalar_lea.hbm %s284_s0, 128 }
   0x4   :  { %p173_p0 = scmp.ne.s32.totalorder %s284_s0, %s172_s18  ;;  %p176_p1 = scmp.lt.u32.totalorder %s172_s18, %s284_s0 }
   0x6   :  { %p178_p2 = pnand %p176_p1, %p173_p0 }
   0x8   :  { %181 = shalt.err (!%p178_p2)
}
   0x9   :  { %s182_s23 = scalar_lea.vmem %s17_s13, 128  ;;  %p187_p4 = scmp.lt.s32.totalorder %s17_s13, %s17_s13 }
   0xa   :  { %p183_p3 = scmp.ne.s32.totalorder %s17_s13, %s182_s23  ;;  %p188_p5 = scmp.lt.s32.totalorder %s182_s23, %s182_s23 }
   0xc   :  { %p189_p6 = por %p188_p5, %p187_p4 }
   0xe   :  { %p190_p7 = pnand %p189_p6, %p183_p3 }
  0x10   :  { %193 = shalt.err (!%p190_p7)
}
  0x11   :  { %19 = dma.hbm_to_vmem [thread:$0]  %s284_s0, 128, %s17_s13, [#allocation3]  }
  0x12   :  { %s194_s28 = scalar_lea.hbm %s285_s1, 512 }
  0x13   :  { %p195_p8 = scmp.ne.s32.totalorder %s285_s1, %s194_s28  ;;  %p198_p9 = scmp.lt.u32.totalorder %s194_s28, %s285_s1 }
  0x15   :  { %p200_p10 = pnand %p198_p9, %p195_p8 }
  0x17   :  { %203 = shalt.err (!%p200_p10)
}
  0x18   :  { %s204_s6 = scalar_lea.vmem %s247_s15, 512  ;;  %p209_p12 = scmp.lt.s32.totalorder %s247_s15, %s247_s15 }
  0x19   :  { %p205_p11 = scmp.ne.s32.totalorder %s247_s15, %s204_s6  ;;  %p210_p13 = scmp.lt.s32.totalorder %s204_s6, %s204_s6 }
  0x1b   :  { %p211_p0 = por %p210_p13, %p209_p12 }
  0x1d   :  { %p212_p1 = pnand %p211_p0, %p205_p11 }
  0x1f   :  { %215 = shalt.err (!%p212_p1)
}
  0x20   :  { %s222_s0 = smov 128   ;;  %s223_s7 = smov 8  }
  0x21   :  { %31 = dma.hbm_to_vmem [thread:$0]  %s285_s1, 512, %s247_s15, [#allocation5], %s222_s0, %s222_s0, %s223_s7  }
  0x22   :  { %216 = dma.done.wait [#allocation3], 128  }
  0x23   :  { %217 = vsyncadd [#allocation3], 4294967168 }
  0x24   :  { %218 = dma.done.wait [#allocation5], 512  }
  0x25   :  { %219 = vsyncadd [#allocation5], 4294966784  ;;  %v224_v0 = vmov 0.0|0.0   ;;  %vm225_vm0 = vmmov 0   ;;  %v226_v1 = vmov 0.0   ;;  %v41_v2 = vld [vmem:[#allocation4] sm:$0xff]  ;;  %v126_v14 = vlaneseq }
  0x26   :  { %157 = vmatprep.subr.bf16.mxu0 %v224_v0  ;;  %154 = vmatprep.mubr.msk.f32.mxu0 %vm225_vm0, %v226_v1  ;;  %v42_v3 = vld [vmem:[#allocation4 + $0x8] sm:$0xff]  ;;  %v43_v4 = vld [vmem:[#allocation4 + $0x10] sm:$0xff]  ;;  %v44_v6 = vld [vmem:[#allocation4 + $0x18] sm:$0xff]  ;;  %vm52_vm1 = vcmask 261120  }
  0x27   :  { %v158_v5 = vpack.c.bf16 %v42_v3, %v41_v2  ;;  %v161_v7 = vpack.c.bf16 %v44_v6, %v43_v4  ;;  %v40_v8 = vld [vmem:[#allocation2] sm:$0xff]  ;;  %v127_v15 = vand.u32 127, %v126_v14 }
  0x28   :  { %v139_v9 = vld [vmem:[%s286_s2] ss:$0 sm:$0xff] }
  0x29   :  { %159 = vmatpush3.bf16.msra.mxu0 %v158_v5  ;;  %vm128_vm2 = vcmp.ge.s32.totalorder %v127_v15, 40 }
  0x2a   :  { %160 = vmatprep.subr.bf16.mxu0 %v224_v0 }
  0x2d   :  { %162 = vmatpush3.bf16.msra.mxu0 %v161_v7 }
  0x30   :  { %155 = vmatmul.mubr.msk.f32.vlgmr.msra.gmra.mrb[0].mxu0 %vm52_vm1, %v40_v8 }
 0x103   :  { %v122_v10 = vpop.f32.mrb[0].mxu0 }
 0x104   :  { %v123_v11 = vadd.f32 %v139_v9, %v122_v10  ;;  %v156_v12 = vpop.f32.mrb[1].mxu0 }
 0x106   :  { %v129_v13 = vmul.f32 1.442695, %v123_v11 }
 0x108   :  { %170 = vpow2.f32 %v129_v13 }
 0x112   :  { %v171_v16 = vpop.eup %170 }
 0x113   :  { %v131_v17 = vsel %vm128_vm2, %v171_v16, %v123_v11 }
 0x114   :  { %132 = vst [vmem:[%s287_s3] sm:$0xff] %v131_v17 }
 0x115   :  { %137 = vsyncpa [#allocation3], 1 }
 0x116   :  { %138 = vsyncpa [#allocation5], 1 }

</bundles_post_ra>
